<compile_context>
chip_gen: v7x
topology: tpu7x:2x2x1
jax: 0.10.0
libtpu: 0.0.40
codegen_flags: <defaults>
</compile_context>

<pallas_src>
import math

import jax
import jax.numpy as jnp
from jax.experimental import pallas as pl
from jax.experimental.pallas import tpu as pltpu


def _round_up(v, m):
    return ((v + m - 1) // m) * m


# --------------------------------------------------------------------------
# Pass 1: support = X @ W   (computed once, single cast to compute dtype)
# --------------------------------------------------------------------------
def _support_kernel(x_ref, w_ref, s_ref):
    s_ref[...] = jnp.dot(
        x_ref[...], w_ref[...], preferred_element_type=jnp.float32
    ).astype(s_ref.dtype)


# --------------------------------------------------------------------------
# Pass 2: output = adj @ support (+ bias), accumulated directly in o_ref
# --------------------------------------------------------------------------
def _aggregate_kernel_bias(adj_ref, s_ref, b_ref, o_ref):
    k = pl.program_id(1)

    @pl.when(k == 0)
    def _init():
        o_ref[...] = jnp.zeros_like(o_ref)

    # Output block is resident across the reduction axis (index_map ignores k),
    # so accumulate in place — no VMEM scratch / finalize copy needed.
    o_ref[...] += jnp.dot(adj_ref[...], s_ref[...],
                          preferred_element_type=jnp.float32)

    @pl.when(k == pl.num_programs(1) - 1)
    def _finalize():
        o_ref[...] = o_ref[...] + b_ref[...]


def _aggregate_kernel_nobias(adj_ref, s_ref, o_ref):
    k = pl.program_id(1)

    @pl.when(k == 0)
    def _init():
        o_ref[...] = jnp.zeros_like(o_ref)

    o_ref[...] += jnp.dot(adj_ref[...], s_ref[...],
                          preferred_element_type=jnp.float32)


# --------------------------------------------------------------------------
# Tiling plan / helpers
# --------------------------------------------------------------------------
def _plan(n, f_in, f_out, tm, tk, compute_dtype):
    """Derive tile sizes and padded dims (deterministic per (n, tm, tk, dtype))."""
    itemsize = jnp.dtype(compute_dtype).itemsize
    row_align = 16 if itemsize == 2 else 8          # bf16 packs 16 rows / vreg
    f_in_p = _round_up(f_in, 128)
    # TODO(synk): round f_out to 256 on v6e/v7x if the kernel becomes compute-bound.
    f_out_p = _round_up(f_out, 128)

    # Output row tile: multiple of row_align, <= padded N.  Split so the
    # parallel row axis has >= 2 tiles when possible (v7x has 2 TensorCores).
    n_row_min = _round_up(n, row_align)
    tm = max(row_align, min(_round_up(tm, row_align), n_row_min))
    if n_row_min // tm < 2 and n_row_min >= 2 * row_align:
        tm = min(tm, _round_up((n_row_min + 1) // 2, row_align))
    n_rows = _round_up(n, tm)

    # Contraction (adj-column / support-row) tile: multiple of 128 (lane-dense).
    n_col_min = _round_up(n, 128)
    tk = max(128, min(_round_up(tk, 128), n_col_min))
    n_cols = _round_up(n, tk)
    return tm, tk, n_rows, n_cols, f_in_p, f_out_p


def _vmem_limit(tile_bytes):
    # Footprint-derived limit + headroom; cap at 56 MiB so it stays clear of
    # v7x's 64 MiB physical VMEM (v5e/v6e have 128 MiB, never tight here).
    return int(min(56 << 20, max(32 << 20, tile_bytes + (8 << 20))))


def prepare_adjacency(adj, *, tm=512, tk=512, compute_dtype=jnp.bfloat16):
    """Pad + cast a dense (N, N) adjacency once per graph.

    Hoists the O(N^2) pad/cast pass out of every forward call; the result can
    be passed directly to graph_convolution (same tm/tk/compute_dtype).
    """
    n = adj.shape[0]
    assert adj.shape == (n, n)
    _, _, n_rows, n_cols, _, _ = _plan(n, 1, 1, tm, tk, compute_dtype)
    if adj.dtype == compute_dtype and adj.shape == (n_rows, n_cols):
        return adj
    return jnp.zeros((n_rows, n_cols), compute_dtype).at[:n, :n].set(
        adj.astype(compute_dtype))


# --------------------------------------------------------------------------
# Wrapper
# --------------------------------------------------------------------------
def graph_convolution(x, adj, weight, bias=None, *, tm=512, tk=512,
                      compute_dtype=jnp.bfloat16):
    """GCN layer forward: adj @ (x @ weight) [+ bias] as two Pallas passes."""
    n, f_in = x.shape
    f_in_w, f_out = weight.shape
    assert f_in_w == f_in

    tm, tk, n_rows, n_cols, f_in_p, f_out_p = _plan(
        n, f_in, f_out, tm, tk, compute_dtype)
    itemsize = jnp.dtype(compute_dtype).itemsize

    # adj: either raw (n, n) (padded + cast here) or pre-prepared via
    # prepare_adjacency() (no extra O(N^2) pass per call).
    if adj.dtype == compute_dtype and adj.shape == (n_rows, n_cols):
        adjp = adj
    else:
        assert adj.shape == (n, n)
        adjp = jnp.zeros((n_rows, n_cols), compute_dtype).at[:n, :n].set(
            adj.astype(compute_dtype))

    if x.dtype == compute_dtype and x.shape == (n_cols, f_in_p):
        xp = x
    else:
        xp = jnp.zeros((n_cols, f_in_p), compute_dtype).at[:n, :f_in].set(
            x.astype(compute_dtype))

    if weight.dtype == compute_dtype and weight.shape == (f_in_p, f_out_p):
        wp = weight
    else:
        wp = jnp.zeros((f_in_p, f_out_p), compute_dtype).at[:f_in, :f_out].set(
            weight.astype(compute_dtype))

    # ---------------- pass 1: support = X @ W (computed once) ----------------
    support_vmem = 2 * (tk * f_in_p + f_in_p * f_out_p + tk * f_out_p) * itemsize
    support = pl.pallas_call(
        _support_kernel,
        out_shape=jax.ShapeDtypeStruct((n_cols, f_out_p), compute_dtype),
        grid_spec=pltpu.PrefetchScalarGridSpec(
            num_scalar_prefetch=0,
            grid=(n_cols // tk,),
            in_specs=[
                pl.BlockSpec((tk, f_in_p), lambda i: (i, 0)),         # x row tile
                pl.BlockSpec((f_in_p, f_out_p), lambda i: (0, 0)),    # resident W
            ],
            out_specs=pl.BlockSpec((tk, f_out_p), lambda i: (i, 0)),
        ),
        compiler_params=pltpu.CompilerParams(
            dimension_semantics=("parallel",),
            vmem_limit_bytes=_vmem_limit(support_vmem),
        ),
    )(xp, wp)

    # ---------------- pass 2: output = adj @ support (+ bias) ----------------
    grid = (n_rows // tm, n_cols // tk)
    adj_buffers = 3 if grid[1] >= 3 else 2        # deeper buffering on the stream
    agg_vmem = (adj_buffers * tm * tk * itemsize
                + 2 * tk * f_out_p * itemsize
                + 2 * tm * f_out_p * 4
                + 2 * f_out_p * 4)

    in_specs = [
        # adj: dominant, strictly streaming operand -> Buffered(3) hides DMA.
        pl.BlockSpec((tm, tk), lambda i, k: (i, k),
                     pipeline_mode=pl.Buffered(adj_buffers)),
        pl.BlockSpec((tk, f_out_p), lambda i, k: (k, 0)),             # support
    ]
    operands = [adjp, support]

    if bias is not None:
        bp = jnp.zeros((1, f_out_p), jnp.float32).at[0, :f_out].set(
            bias.reshape(-1).astype(jnp.float32))
        in_specs.append(pl.BlockSpec((1, f_out_p), lambda i, k: (0, 0)))
        operands.append(bp)
        kernel = _aggregate_kernel_bias
    else:
        kernel = _aggregate_kernel_nobias

    # Output stays f32 to match the PyTorch reference; downstream callers that
    # accept bf16 can cast after the slice (output traffic is minor here).
    out_padded = pl.pallas_call(
        kernel,
        out_shape=jax.ShapeDtypeStruct((n_rows, f_out_p), jnp.float32),
        grid_spec=pltpu.PrefetchScalarGridSpec(
            num_scalar_prefetch=0,
            grid=grid,
            in_specs=in_specs,
            out_specs=pl.BlockSpec((tm, f_out_p), lambda i, k: (i, 0)),
        ),
        compiler_params=pltpu.CompilerParams(
            dimension_semantics=("parallel", "arbitrary"),
            vmem_limit_bytes=_vmem_limit(agg_vmem),
        ),
    )(*operands)

    return out_padded[:n, :f_out]


def init_gcn_params(key, in_features, out_features, bias=True):
    """Deterministic re-implementation of GraphConvolution.reset_parameters()."""
    stdv = 1.0 / math.sqrt(out_features)
    k_w, k_b = jax.random.split(key)
    weight = jax.random.uniform(
        k_w, (in_features, out_features), dtype=jnp.float32, minval=-stdv, maxval=stdv
    )
    b = None
    if bias:
        b = jax.random.uniform(
            k_b, (out_features,), dtype=jnp.float32, minval=-stdv, maxval=stdv
        )
    return weight, b


if __name__ == "__main__":
    key = jax.random.PRNGKey(0)
    k_x, k_adj, k_param, k_x2, k_adj2 = jax.random.split(key, 5)

    def make_graph(kx, ka, n, f_in):
        xg = jax.random.normal(kx, (n, f_in), dtype=jnp.float32)
        a_raw = (jax.random.uniform(ka, (n, n)) < 0.4).astype(jnp.float32)
        a_sym = jnp.clip(a_raw + a_raw.T + jnp.eye(n, dtype=jnp.float32), 0.0, 1.0)
        adj_g = a_sym / jnp.sum(a_sym, axis=1, keepdims=True)
        return xg, adj_g

    # Small GCN problem: 8 nodes, 16 input features -> 32 output features.
    N, F_IN, F_OUT = 8, 16, 32
    x, adj = make_graph(k_x, k_adj, N, F_IN)
    weight, bias = init_gcn_params(k_param, F_IN, F_OUT, bias=True)

    ref = adj @ (x @ weight) + bias[None, :]

    # bf16 compute (default path), bias.
    out = jax.block_until_ready(graph_convolution(x, adj, weight, bias))
    assert out.shape == (N, F_OUT)
    assert jnp.allclose(out, ref, atol=3e-2, rtol=3e-2)

    # f32 compute path, tight tolerance.
    out32 = jax.block_until_ready(
        graph_convolution(x, adj, weight, bias, compute_dtype=jnp.float32))
    assert jnp.allclose(out32, ref, atol=1e-5, rtol=1e-5)

    # No-bias kernel variant.
    out_nb = jax.block_until_ready(graph_convolution(x, adj, weight, None))
    assert jnp.allclose(out_nb, adj @ (x @ weight), atol=3e-2, rtol=3e-2)

    # Multi-tile case with a pre-prepared (padded/cast once per graph) adjacency:
    # grid = (2, 2) with tm = tk = 128 exercises the parallel row-tile axis,
    # reduction-axis accumulation directly in o_ref, and the gated bias add.
    N2 = 256
    x2, adj2 = make_graph(k_x2, k_adj2, N2, F_IN)
    ref2 = adj2 @ (x2 @ weight) + bias[None, :]
    adj2_prep = prepare_adjacency(adj2, tm=128, tk=128)
    out2 = jax.block_until_ready(
        graph_convolution(x2, adj2_prep, weight, bias, tm=128, tk=128))
    assert out2.shape == (N2, F_OUT)
    assert jnp.allclose(out2, ref2, atol=3e-2, rtol=3e-2)

    # Default large-tile path (tm=tk=512 clamps to N and splits the row axis
    # into 2 tiles so both v7x TensorCores get work).
    out2b = jax.block_until_ready(graph_convolution(x2, adj2, weight, bias))
    assert jnp.allclose(out2b, ref2, atol=3e-2, rtol=3e-2)

    print("KERNEL_OK")
</pallas_src>

<mosaic_0001>
module attributes {stable_mosaic.version = 11 : i64} {
  func.func @_support_kernel(%arg0: i32, %arg1: memref<128x128xbf16, #tpu.memory_space<vmem>>, %arg2: memref<128x128xbf16, #tpu.memory_space<vmem>>, %arg3: memref<128x128xbf16, #tpu.memory_space<vmem>>) attributes {dimension_semantics = [#tpu.dimension_semantics<parallel>], iteration_bounds = array<i64: 1>, scalar_prefetch = 0 : i64, scratch_operands = 0 : i64, tpu.core_type = #tpu.core_type<tc>, window_params = [{transform_indices = @transform_0, window_bounds = array<i64: 128, 128>}, {pipeline_mode = #tpu.pipeline_mode<synchronous>, transform_indices = @transform_1, window_bounds = array<i64: 128, 128>}, {transform_indices = @transform_2, window_bounds = array<i64: 128, 128>}]} {
    %c0 = arith.constant 0 : index
    %c0_0 = arith.constant 0 : index
    %0 = vector.load %arg1[%c0, %c0_0] : memref<128x128xbf16, #tpu.memory_space<vmem>>, vector<128x128xbf16>
    %c0_1 = arith.constant 0 : index
    %c0_2 = arith.constant 0 : index
    %1 = vector.load %arg2[%c0_1, %c0_2] : memref<128x128xbf16, #tpu.memory_space<vmem>>, vector<128x128xbf16>
    %cst = arith.constant dense<0.000000e+00> : vector<128x128xf32>
    %2 = tpu.matmul %0, %1, %cst {dimension_numbers = #tpu.dot_dimension_numbers<[1], [0], [0], [1], [0, 0, 1, 1], [], []>} : vector<128x128xbf16>, vector<128x128xbf16>, vector<128x128xf32> -> vector<128x128xf32>
    %3 = arith.truncf %2 : vector<128x128xf32> to vector<128x128xbf16>
    %c0_3 = arith.constant 0 : index
    %c0_4 = arith.constant 0 : index
    %4 = vector.load %arg3[%c0_3, %c0_4] : memref<128x128xbf16, #tpu.memory_space<vmem>>, vector<128x128xbf16>
    tpu.vector_store %arg3[%c0_3, %c0_4], %3 {strides = array<i32>} : memref<128x128xbf16, #tpu.memory_space<vmem>>, vector<128x128xbf16>,
    return
  }
  func.func @transform_0(%arg0: i32) -> (i32, i32) {
    %c0_i32 = arith.constant 0 : i32
    %c0_i32_0 = arith.constant 0 : i32
    return %arg0, %c0_i32 : i32, i32
  }
  func.func @transform_1(%arg0: i32) -> (i32, i32) {
    %c0_i32 = arith.constant 0 : i32
    %c0_i32_0 = arith.constant 0 : i32
    %c0_i32_1 = arith.constant 0 : i32
    return %c0_i32, %c0_i32_0 : i32, i32
  }
  func.func @transform_2(%arg0: i32) -> (i32, i32) {
    %c0_i32 = arith.constant 0 : i32
    %c0_i32_0 = arith.constant 0 : i32
    return %arg0, %c0_i32 : i32, i32
  }
}

</mosaic_0001>

<bundles_post_ra>
// kernel: tpu_custom_call.1
= control target key start
LH: loop header
LB: loop body
LE: loop exit
PB: predicated region body
PF: predicated region fallthrough
CT: control target
= control target key end

     0   :  { %7 = vsyncpa [#allocation3], 0  ;;  %s681_s0 = inlined_call_operand.hbm [shape: bf16[128,128], index: 0, kind: input, shape index: {}]   ;;  %s682_s1 = inlined_call_operand.hbm [shape: bf16[128,128], index: 1, kind: input, shape index: {}]   ;;  %s683_s2 = inlined_call_operand.hbm [shape: bf16[128,128], index: 2, kind: output, shape index: {}]  }
   0x1   :  { %8 = vsyncpa [#allocation6], 0 }
   0x2   :  { %9 = vsyncpa [#allocation4], 0  ;;  %s616_s9 = smov [#allocation2]   ;;  %s544_s13 = scalar_lea.hbm %s681_s0, 1024 }
   0x3   :  { %s15_s10 = sshll.u32 %s616_s9, 4  ;;  %p545_p0 = scmp.ne.s32.totalorder %s681_s0, %s544_s13  ;;  %s16_s10 = int_to_ptr.vmem [resolvable:$true] %s15_s10 }
   0x4   :  { %p548_p1 = scmp.lt.u32.totalorder %s544_s13, %s681_s0 }
   0x6   :  { %p550_p2 = pnand %p548_p1, %p545_p0 }
   0x8   :  { %553 = shalt.err (!%p550_p2)
}
   0x9   :  { %s554_s18 = scalar_lea.vmem %s16_s10, 1024  ;;  %p559_p4 = scmp.lt.s32.totalorder %s16_s10, %s16_s10 }
   0xa   :  { %p555_p3 = scmp.ne.s32.totalorder %s16_s10, %s554_s18  ;;  %p560_p5 = scmp.lt.s32.totalorder %s554_s18, %s554_s18 }
   0xc   :  { %p561_p6 = por %p560_p5, %p559_p4 }
   0xe   :  { %p562_p7 = pnand %p561_p6, %p555_p3 }
  0x10   :  { %565 = shalt.err (!%p562_p7)
}
  0x11   :  { %s617_s19 = smov 64   ;;  %s618_s20 = smov 4  }
  0x12   :  { %21 = dma.hbm_to_vmem [thread:$0]  %s681_s0, 1024, %s16_s10, [#allocation3], %s617_s19, %s617_s19, %s618_s20  }
  0x13   :  { %s619_s23 = smov [#allocation5]   ;;  %s566_s27 = scalar_lea.hbm %s682_s1, 1024 }
  0x14   :  { %s27_s24 = sshll.u32 %s619_s23, 4  ;;  %p567_p8 = scmp.ne.s32.totalorder %s682_s1, %s566_s27  ;;  %s28_s24 = int_to_ptr.vmem [resolvable:$true] %s27_s24 }
  0x15   :  { %p570_p9 = scmp.lt.u32.totalorder %s566_s27, %s682_s1 }
  0x17   :  { %p572_p10 = pnand %p570_p9, %p567_p8 }
  0x19   :  { %575 = shalt.err (!%p572_p10)
}
  0x1a   :  { %s576_s4 = scalar_lea.vmem %s28_s24, 1024  ;;  %p581_p12 = scmp.lt.s32.totalorder %s28_s24, %s28_s24 }
  0x1b   :  { %p577_p11 = scmp.ne.s32.totalorder %s28_s24, %s576_s4  ;;  %p582_p13 = scmp.lt.s32.totalorder %s576_s4, %s576_s4 }
  0x1d   :  { %p583_p0 = por %p582_p13, %p581_p12 }
  0x1f   :  { %p584_p1 = pnand %p583_p0, %p577_p11 }
  0x21   :  { %587 = shalt.err (!%p584_p1)
}
  0x22   :  { %33 = dma.hbm_to_vmem [thread:$0]  %s682_s1, 1024, %s28_s24, [#allocation6], %s617_s19, %s617_s19, %s618_s20  }
  0x23   :  { %610 = dma.done.wait [#allocation3], 1024  }
  0x24   :  { %611 = vsyncadd [#allocation3], 4294966272 }
  0x25   :  { %612 = dma.done.wait [#allocation6], 1024  }
  0x26   :  { %613 = vsyncadd [#allocation6], 4294966272  ;;  %v528_v0 = vld [vmem:[#allocation5] sm:$0xff]   ;;  %v529_v1 = vld [vmem:[#allocation5 + $0x8] sm:$0xff]   ;;  %s620_s1 = smov [#allocation7]  }
  0x27   :  { %475 = vmatprep.subr.bf16.mxu0 %v528_v0  ;;  %507 = vmatprep.subr.bf16.mxu1 %v528_v0  ;;  %v530_v2 = vld [vmem:[#allocation5 + $0x10] sm:$0xff]   ;;  %v531_v3 = vld [vmem:[#allocation5 + $0x18] sm:$0xff]   ;;  %v536_v4 = vld [vmem:[#allocation2] sm:$0xff]   ;;  %s351_s6 = sshll.u32 %s620_s1, 4  ;;  %s352_s6 = int_to_ptr.vmem [resolvable:$true] %s351_s6 }
  0x28   :  { %476 = vmatpush3.bf16.msra.mxu0 %v528_v0  ;;  %515 = vmatpush3.bf16.msra.mxu1 %v528_v0  ;;  %v537_v5 = vld [vmem:[#allocation2 + $0x20] sm:$0xff]   ;;  %v533_v7 = vld [vmem:[#allocation5 + $0x28] sm:$0xff]   ;;  %v534_v8 = vld [vmem:[#allocation5 + $0x30] sm:$0xff]   ;;  %s588_s7 = scalar_lea.vmem %s352_s6, 1024  ;;  %p593_p3 = scmp.lt.s32.totalorder %s352_s6, %s352_s6 }
  0x29   :  { %477 = vmatprep.subr.bf16.mxu0 %v529_v1  ;;  %508 = vmatprep.subr.bf16.mxu1 %v529_v1  ;;  %v532_v6 = vld [vmem:[#allocation5 + $0x20] sm:$0xff]   ;;  %v535_v9 = vld [vmem:[#allocation5 + $0x38] sm:$0xff]   ;;  %v538_v10 = vld [vmem:[#allocation2 + $0x8] sm:$0xff]   ;;  %p589_p2 = scmp.ne.s32.totalorder %s352_s6, %s588_s7  ;;  %p594_p4 = scmp.lt.s32.totalorder %s588_s7, %s588_s7 }
  0x2a   :  { %491 = vmatprep.mubr.bf16.mxu0 %v536_v4  ;;  %499 = vmatprep.mubr.bf16.mxu1 %v537_v5  ;;  %v539_v11 = vld [vmem:[#allocation2 + $0x28] sm:$0xff]   ;;  %v540_v12 = vld [vmem:[#allocation2 + $0x10] sm:$0xff]   ;;  %v542_v14 = vld [vmem:[#allocation2 + $0x18] sm:$0xff]  }
  0x2b   :  { %v541_v13 = vld [vmem:[#allocation2 + $0x30] sm:$0xff]   ;;  %v543_v15 = vld [vmem:[#allocation2 + $0x38] sm:$0xff]   ;;  %p595_p5 = por %p594_p4, %p593_p3 }
  0x2c   :  { %478 = vmatpush3.bf16.msra.mxu0 %v529_v1  ;;  %516 = vmatpush3.bf16.msra.mxu1 %v529_v1 }
  0x2d   :  { %479 = vmatprep.subr.bf16.mxu0 %v530_v2  ;;  %509 = vmatprep.subr.bf16.mxu1 %v530_v2  ;;  %p596_p6 = pnand %p595_p5, %p589_p2 }
  0x30   :  { %480 = vmatpush3.bf16.msra.mxu0 %v530_v2  ;;  %517 = vmatpush3.bf16.msra.mxu1 %v530_v2 }
  0x31   :  { %481 = vmatprep.subr.bf16.mxu0 %v531_v3  ;;  %510 = vmatprep.subr.bf16.mxu1 %v531_v3 }
  0x34   :  { %482 = vmatpush3.bf16.msra.mxu0 %v531_v3  ;;  %518 = vmatpush3.bf16.msra.mxu1 %v531_v3 }
  0x35   :  { %483 = vmatprep.subr.bf16.mxu0 %v532_v6  ;;  %511 = vmatprep.subr.bf16.mxu1 %v532_v6 }
  0x38   :  { %484 = vmatpush3.bf16.msra.mxu0 %v532_v6  ;;  %519 = vmatpush3.bf16.msra.mxu1 %v532_v6 }
  0x39   :  { %485 = vmatprep.subr.bf16.mxu0 %v533_v7  ;;  %512 = vmatprep.subr.bf16.mxu1 %v533_v7 }
  0x3c   :  { %486 = vmatpush3.bf16.msra.mxu0 %v533_v7  ;;  %520 = vmatpush3.bf16.msra.mxu1 %v533_v7 }
  0x3d   :  { %487 = vmatprep.subr.bf16.mxu0 %v534_v8  ;;  %513 = vmatprep.subr.bf16.mxu1 %v534_v8 }
  0x40   :  { %488 = vmatpush3.bf16.msra.mxu0 %v534_v8  ;;  %521 = vmatpush3.bf16.msra.mxu1 %v534_v8 }
  0x41   :  { %489 = vmatprep.subr.bf16.mxu0 %v535_v9  ;;  %514 = vmatprep.subr.bf16.mxu1 %v535_v9 }
  0x44   :  { %490 = vmatpush3.bf16.msra.mxu0 %v535_v9  ;;  %522 = vmatpush3.bf16.msra.mxu1 %v535_v9 }
  0x47   :  { %492 = vmatmul.mubr.bf16.vlgmr.msra.gmra.mrb[0].mxu0 %v538_v10  ;;  %500 = vmatmul.mubr.bf16.vlgmr.msra.gmra.mrb[0].mxu1 %v539_v11 }
  0x48   :  { %495 = vmatprep.mubr.bf16.mxu0 %v540_v12  ;;  %503 = vmatprep.mubr.bf16.mxu1 %v541_v13 }
  0x4f   :  { %496 = vmatmul.mubr.bf16.gmra.mrb[4].mxu0 %v542_v14  ;;  %504 = vmatmul.mubr.bf16.gmra.mrb[4].mxu1 %v543_v15 }
 0x11a   :  { %v493_v16 = vpop.f32.mrb[0].mxu0  ;;  %v501_v17 = vpop.f32.mrb[0].mxu1 }
 0x11b   :  { %v203_v18 = vpop.f32.mrb[1].mxu0  ;;  %v235_v19 = vpop.f32.mrb[1].mxu1 }
 0x11c   :  { %v494_v20 = vpop.f32.mrb[2].mxu0  ;;  %v502_v21 = vpop.f32.mrb[2].mxu1 }
 0x11d   :  { %v420_v22 = vpack.c.bf16 %v494_v20, %v493_v16  ;;  %v440_v23 = vpack.c.bf16 %v502_v21, %v501_v17  ;;  %v206_v24 = vpop.f32.mrb[3].mxu0  ;;  %v238_v25 = vpop.f32.mrb[3].mxu1 }
 0x11e   :  { %v415_v26 = vpack.c.bf16 %v206_v24, %v203_v18  ;;  %v435_v27 = vpack.c.bf16 %v238_v25, %v235_v19 }
 0x11f   :  { %452 = vst [vmem:[#allocation7 + $0x8] sm:$0xff] %v420_v22   ;;  %456 = vst [vmem:[#allocation7 + $0x28] sm:$0xff] %v440_v23  }
 0x120   :  { %416 = vst [vmem:[#allocation7] sm:$0xff] %v415_v26   ;;  %455 = vst [vmem:[#allocation7 + $0x20] sm:$0xff] %v435_v27  }
 0x122   :  { %v497_v28 = vpop.f32.mrb[4].mxu0  ;;  %v505_v29 = vpop.f32.mrb[4].mxu1 }
 0x123   :  { %v219_v30 = vpop.f32.mrb[5].mxu0  ;;  %v251_v31 = vpop.f32.mrb[5].mxu1 }
 0x124   :  { %v498_v32 = vpop.f32.mrb[6].mxu0  ;;  %v506_v33 = vpop.f32.mrb[6].mxu1 }
 0x125   :  { %v430_v34 = vpack.c.bf16 %v498_v32, %v497_v28  ;;  %v450_v35 = vpack.c.bf16 %v506_v33, %v505_v29  ;;  %v222_v36 = vpop.f32.mrb[7].mxu0  ;;  %v254_v37 = vpop.f32.mrb[7].mxu1 }
 0x126   :  { %v425_v38 = vpack.c.bf16 %v222_v36, %v219_v30  ;;  %v445_v39 = vpack.c.bf16 %v254_v37, %v251_v31 }
 0x127   :  { %454 = vst [vmem:[#allocation7 + $0x18] sm:$0xff] %v430_v34   ;;  %458 = vst [vmem:[#allocation7 + $0x38] sm:$0xff] %v450_v35  }
 0x128   :  { %453 = vst [vmem:[#allocation7 + $0x10] sm:$0xff] %v425_v38   ;;  %457 = vst [vmem:[#allocation7 + $0x30] sm:$0xff] %v445_v39  }
 0x129   :  { %599 = shalt.err (!%p596_p6)
}
 0x12a   :  { %s600_s10 = scalar_lea.hbm %s683_s2, 1024 }
 0x12b   :  { %p601_p7 = scmp.ne.s32.totalorder %s683_s2, %s600_s10  ;;  %p604_p8 = scmp.lt.u32.totalorder %s600_s10, %s683_s2 }
 0x12d   :  { %p606_p9 = pnand %p604_p8, %p601_p7 }
 0x12f   :  { %609 = shalt.err (!%p606_p9)
}
 0x130   :  { %357 = dma.vmem_to_hbm [thread:$0]  %s352_s6, 1024, %s683_s2, [#allocation4], %s617_s19, %s617_s19, %s618_s20  }
 0x131   :  { %614 = dma.done.wait [#allocation4], 1024  }
 0x132   :  { %615 = vsyncadd [#allocation4], 4294966272 }
 0x133   :  { %361 = vsyncpa [#allocation3], 1 }
 0x134   :  { %362 = vsyncpa [#allocation6], 1 }
 0x135   :  { %363 = vsyncpa [#allocation4], 1 }

</bundles_post_ra>
